<compile_context>
chip_gen: v7x
topology: tpu7x:2x2x1
jax: 0.10.0
libtpu: 0.0.40
codegen_flags: <defaults>
</compile_context>

<pallas_src>
import functools

import jax
import jax.numpy as jnp
from jax.experimental import pallas as pl
from jax.experimental.pallas import tpu as pltpu


_H = 32          # hidden width of both layers
_LANES = 128     # lane width of the packed weight buffer


def _round_up(v, m):
    return (v + m - 1) // m * m


# -----------------------------------------------------------------------------
# One-time weight packing (hoisted out of the per-call hot path).
# -----------------------------------------------------------------------------
def pack_corr_params(params, input_size, lane_width=_LANES):
    """Pack the 6 Linear params into ONE padded (104, lane_width) f32 buffer.

    Row layout (valid lanes):
      rows  0..31 : [w1.T | b1]            lanes 0..D   (b1 folded against the
                                                          ones row in the data)
      rows 32..63 : w2.T                   lanes 0..31
      rows 64..95 : b2 pre-broadcast       all lanes
      row  96     : w3[:,1] - w3[:,0]      lanes 0..31  (logit-difference row)
      row  97     : (b3[1]-b3[0]) bcast    all lanes
      rows 98..103: zero pad (sublane count multiple of 8)
    """
    w1, b1, w2, b2, w3, b3 = params
    lw = lane_width
    assert input_size + 1 <= lw

    def pad_lanes(a):
        a = a.astype(jnp.float32)
        return jnp.pad(a, ((0, 0), (0, lw - a.shape[1])))

    wb1 = jnp.concatenate([w1.T, b1.reshape(-1, 1)], axis=1)            # (32, D+1)
    w2t = w2.T                                                           # (32, 32)
    b2b = jnp.broadcast_to(b2.reshape(-1, 1).astype(jnp.float32), (_H, lw))
    wd = (w3[:, 1] - w3[:, 0]).reshape(1, -1)                            # (1, 32)
    bdb = jnp.full((1, lw), b3[0, 1] - b3[0, 0], jnp.float32)            # (1, lw)

    packed = jnp.concatenate(
        [pad_lanes(wb1), pad_lanes(w2t), b2b, pad_lanes(wd), bdb], axis=0)
    pad_rows = _round_up(packed.shape[0], 8) - packed.shape[0]
    return jnp.pad(packed, ((0, pad_rows), (0, 0)))                      # (104, lw)


# -----------------------------------------------------------------------------
# Per-call data packing: one fused HLO, one DMA.
# -----------------------------------------------------------------------------
def _pack_data(x, y, s):
    """Rows 0..D-1 = x.T, row D = ones (layer-1 bias fold), row D+1 = y,
    row D+2 = s[:, 1]; sublane count padded to a multiple of 8."""
    n, d_in = x.shape
    rows = d_in + 3
    pad = _round_up(rows, 8) - rows
    return jnp.concatenate(
        [x.T.astype(jnp.float32),
         jnp.ones((1, n), jnp.float32),
         y.reshape(1, n).astype(jnp.float32),
         s[:, 1].reshape(1, n).astype(jnp.float32),
         jnp.zeros((pad, n), jnp.float32)],
        axis=0)                                                          # (rd, N)


# -----------------------------------------------------------------------------
# Kernel
# -----------------------------------------------------------------------------
def _corr_kernel(d_in, data_ref, w_ref, out_ref):
    n = data_ref.shape[1]
    inv_n = 1.0 / n

    x_aug = data_ref[0:d_in + 1, :]               # (D+1, N)  xT rows + ones row
    y = data_ref[d_in + 1:d_in + 2, :]            # (1, N)   labels in {0., 1.}
    sb = data_ref[d_in + 2:d_in + 3, :]           # (1, N)   sensitive attr col 1

    # --- layer 1: bias folded via the ones row of x_aug ---
    h1 = jnp.maximum(
        jnp.dot(w_ref[0:_H, 0:d_in + 1], x_aug,
                preferred_element_type=jnp.float32), 0.0)                # (32, N)

    # --- layer 2: bias rows are pre-broadcast in the packed weight buffer ---
    h2 = jnp.maximum(
        jnp.dot(w_ref[_H:2 * _H, 0:_H], h1,
                preferred_element_type=jnp.float32)
        + w_ref[2 * _H:3 * _H, 0:n], 0.0)                                # (32, N)

    # --- logit difference d = logit_1 - logit_0 ---
    d = (jnp.dot(w_ref[3 * _H:3 * _H + 1, 0:_H], h2,
                 preferred_element_type=jnp.float32)
         + w_ref[3 * _H + 1:3 * _H + 2, 0:n])                            # (1, N)

    # --- CE via stable softplus of the logit difference; p1 reuses softplus ---
    # softplus(d) = max(d,0) + log(1 + exp(-|d|))   (log1p form avoided: the
    # large-|d| term vanishes anyway and plain log is guaranteed to lower).
    sp = jnp.maximum(d, 0.0) + jnp.log(1.0 + jnp.exp(-jnp.abs(d)))
    picked = y * d - sp                           # = y*log p1 + (1-y)*log p0
    p1 = jnp.exp(d - sp)                          # = sigmoid(d) = softmax[:, 1]

    # --- single fused cross-lane reduction for CE + single-pass Pearson ---
    a = p1 * y
    b = sb
    stack = jnp.concatenate(
        [picked, a, b, a * a, b * b, a * b, jnp.zeros((2, n), jnp.float32)],
        axis=0)                                                          # (8, N)
    red = jnp.sum(stack, axis=-1, keepdims=True)                         # (8, 1)

    s_pick = red[0:1, :]
    sa = red[1:2, :]
    sb_ = red[2:3, :]
    saa = red[3:4, :]
    sbb = red[4:5, :]
    sab = red[5:6, :]

    ce = -s_pick * inv_n                          # (1, 1)
    ma = sa * inv_n
    mb = sb_ * inv_n
    cov = sab - n * ma * mb
    va = saa - n * ma * ma
    vb = sbb - n * mb * mb
    closs = cov * jax.lax.rsqrt(va * vb + 1e-12)  # (1, 1)

    out_ref[0:1, 0:1] = ce
    out_ref[0:1, 1:2] = closs


# -----------------------------------------------------------------------------
# Wrapper
# -----------------------------------------------------------------------------
@jax.jit
def corr_forward(x, y, s, packed_w):
    """Returns (ce_loss, c_loss) as f32 scalars. packed_w from pack_corr_params."""
    n, d_in = x.shape
    assert n % _LANES == 0, "TODO(synk): lane masking for partial batches"
    assert packed_w.shape[1] >= n

    data = _pack_data(x, y, s)
    vmem = pl.BlockSpec(memory_space=pltpu.MemorySpace.VMEM)
    out = pl.pallas_call(
        functools.partial(_corr_kernel, d_in),
        out_shape=jax.ShapeDtypeStruct((1, 2), jnp.float32),
        in_specs=[vmem, vmem],
        out_specs=vmem,
    )(data, packed_w)
    return out[0, 0], out[0, 1]


# -----------------------------------------------------------------------------
# Param init + plain-JAX reference
# -----------------------------------------------------------------------------
def init_params(key, input_size, hidden=(32, 32), out=2):
    """Deterministic init, PyTorch Linear-style U(-1/sqrt(fan_in), 1/sqrt(fan_in))."""
    dims = [(input_size, hidden[0]), (hidden[0], hidden[1]), (hidden[1], out)]
    params = []
    for (din, dout) in dims:
        key, kw, kb = jax.random.split(key, 3)
        bound = 1.0 / jnp.sqrt(din)
        w = jax.random.uniform(kw, (din, dout), jnp.float32, -bound, bound)
        b = jax.random.uniform(kb, (1, dout), jnp.float32, -bound, bound)
        params += [w, b]
    return tuple(params)


def reference_forward(x, y, s, params):
    """Plain-JAX reference for sanity checking (2-class softmax form)."""
    w1, b1, w2, b2, w3, b3 = params
    h1 = jnp.maximum(x @ w1 + b1, 0.0)
    h2 = jnp.maximum(h1 @ w2 + b2, 0.0)
    logits = h2 @ w3 + b3
    log_p = jax.nn.log_softmax(logits, axis=-1)
    yf = y.astype(jnp.float32)
    picked = yf * log_p[:, 1] + (1.0 - yf) * log_p[:, 0]
    ce = -jnp.mean(picked)
    p1 = jax.nn.softmax(logits, axis=-1)[:, 1]
    a = p1 * yf
    b = s[:, 1]
    da = a - jnp.mean(a)
    db = b - jnp.mean(b)
    c = jnp.sum(da * db) * jax.lax.rsqrt(jnp.sum(da * da) * jnp.sum(db * db) + 1e-12)
    return ce, c


if __name__ == "__main__":
    N, D = 128, 16                     # batch, input_size
    key = jax.random.PRNGKey(0)
    kx, ky, ks, kp = jax.random.split(key, 4)

    x = jax.random.normal(kx, (N, D), jnp.float32)
    y = jax.random.bernoulli(ky, 0.5, (N,)).astype(jnp.float32)   # labels in {0,1}
    s = jax.random.uniform(ks, (N, 2), jnp.float32)               # sensitive attr, col 1 used

    params = init_params(kp, D)
    packed_w = jax.block_until_ready(pack_corr_params(params, D))  # done once

    ce, cl = corr_forward(x, y, s, packed_w)
    jax.block_until_ready((ce, cl))

    ce_ref, cl_ref = reference_forward(x, y, s, params)
    assert jnp.allclose(ce, ce_ref, atol=1e-4, rtol=1e-4), (ce, ce_ref)
    assert jnp.allclose(cl, cl_ref, atol=1e-4, rtol=1e-4), (cl, cl_ref)

    print("KERNEL_OK")
</pallas_src>

<mosaic_0001>
module attributes {stable_mosaic.version = 11 : i64} {
  func.func @_corr_kernel(%arg0: memref<24x128xf32, #tpu.memory_space<vmem>>, %arg1: memref<104x128xf32, #tpu.memory_space<vmem>>, %arg2: memref<1x2xf32, #tpu.memory_space<vmem>>) attributes {dimension_semantics = [], scalar_prefetch = 0 : i64, scratch_operands = 0 : i64, tpu.core_type = #tpu.core_type<tc>} {
    %c0 = arith.constant 0 : index
    %c0_0 = arith.constant 0 : index
    %0 = vector.load %arg0[%c0, %c0_0] : memref<24x128xf32, #tpu.memory_space<vmem>>, vector<17x128xf32>
    %c17 = arith.constant 17 : index
    %c0_1 = arith.constant 0 : index
    %1 = vector.load %arg0[%c17, %c0_1] : memref<24x128xf32, #tpu.memory_space<vmem>>, vector<1x128xf32>
    %c18 = arith.constant 18 : index
    %c0_2 = arith.constant 0 : index
    %2 = vector.load %arg0[%c18, %c0_2] : memref<24x128xf32, #tpu.memory_space<vmem>>, vector<1x128xf32>
    %c0_3 = arith.constant 0 : index
    %c0_4 = arith.constant 0 : index
    %3 = vector.load %arg1[%c0_3, %c0_4] : memref<104x128xf32, #tpu.memory_space<vmem>>, vector<32x17xf32>
    %cst = arith.constant dense<0.000000e+00> : vector<32x128xf32>
    %4 = tpu.matmul %3, %0, %cst {dimension_numbers = #tpu.dot_dimension_numbers<[1], [0], [0], [1], [0, 0, 1, 1], [], []>} : vector<32x17xf32>, vector<17x128xf32>, vector<32x128xf32> -> vector<32x128xf32>
    %cst_5 = arith.constant 0.000000e+00 : f32
    %5 = vector.broadcast %cst_5 : f32 to vector<32x128xf32>
    %6 = arith.maximumf %4, %5 : vector<32x128xf32>
    %c32 = arith.constant 32 : index
    %c0_6 = arith.constant 0 : index
    %7 = vector.load %arg1[%c32, %c0_6] : memref<104x128xf32, #tpu.memory_space<vmem>>, vector<32x32xf32>
    %cst_7 = arith.constant dense<0.000000e+00> : vector<32x128xf32>
    %8 = tpu.matmul %7, %6, %cst_7 {dimension_numbers = #tpu.dot_dimension_numbers<[1], [0], [0], [1], [0, 0, 1, 1], [], []>} : vector<32x32xf32>, vector<32x128xf32>, vector<32x128xf32> -> vector<32x128xf32>
    %c64 = arith.constant 64 : index
    %c0_8 = arith.constant 0 : index
    %9 = vector.load %arg1[%c64, %c0_8] : memref<104x128xf32, #tpu.memory_space<vmem>>, vector<32x128xf32>
    %10 = arith.addf %8, %9 : vector<32x128xf32>
    %cst_9 = arith.constant 0.000000e+00 : f32
    %11 = vector.broadcast %cst_9 : f32 to vector<32x128xf32>
    %12 = arith.maximumf %10, %11 : vector<32x128xf32>
    %c96 = arith.constant 96 : index
    %c0_10 = arith.constant 0 : index
    %13 = vector.load %arg1[%c96, %c0_10] : memref<104x128xf32, #tpu.memory_space<vmem>>, vector<1x32xf32>
    %cst_11 = arith.constant dense<0.000000e+00> : vector<1x128xf32>
    %14 = tpu.matmul %13, %12, %cst_11 {dimension_numbers = #tpu.dot_dimension_numbers<[1], [0], [0], [1], [0, 0, 1, 1], [], []>} : vector<1x32xf32>, vector<32x128xf32>, vector<1x128xf32> -> vector<1x128xf32>
    %c97 = arith.constant 97 : index
    %c0_12 = arith.constant 0 : index
    %15 = vector.load %arg1[%c97, %c0_12] : memref<104x128xf32, #tpu.memory_space<vmem>>, vector<1x128xf32>
    %16 = arith.addf %14, %15 : vector<1x128xf32>
    %cst_13 = arith.constant 0.000000e+00 : f32
    %17 = vector.broadcast %cst_13 : f32 to vector<1x128xf32>
    %18 = arith.maximumf %16, %17 : vector<1x128xf32>
    %19 = math.absf %16 : vector<1x128xf32>
    %cst_14 = arith.constant 0.000000e+00 : f32
    %20 = vector.broadcast %cst_14 : f32 to vector<1x128xf32>
    %21 = arith.subf %20, %19 : vector<1x128xf32>
    %22 = math.exp %21 : vector<1x128xf32>
    %cst_15 = arith.constant 1.000000e+00 : f32
    %23 = vector.broadcast %cst_15 : f32 to vector<1x128xf32>
    %24 = arith.addf %23, %22 : vector<1x128xf32>
    %25 = math.log %24 : vector<1x128xf32>
    %26 = arith.addf %18, %25 : vector<1x128xf32>
    %27 = arith.mulf %1, %16 : vector<1x128xf32>
    %28 = arith.subf %27, %26 : vector<1x128xf32>
    %29 = arith.subf %16, %26 : vector<1x128xf32>
    %30 = math.exp %29 : vector<1x128xf32>
    %31 = arith.mulf %30, %1 : vector<1x128xf32>
    %32 = arith.mulf %31, %31 : vector<1x128xf32>
    %33 = arith.mulf %2, %2 : vector<1x128xf32>
    %34 = arith.mulf %31, %2 : vector<1x128xf32>
    %cst_16 = arith.constant 0.000000e+00 : f32
    %35 = vector.broadcast %cst_16 : f32 to vector<2x128xf32>
    %36 = tpu.concatenate %28, %31, %2, %32, %33, %34, %35 in 0 : vector<1x128xf32>, vector<1x128xf32>, vector<1x128xf32>, vector<1x128xf32>, vector<1x128xf32>, vector<1x128xf32>, vector<2x128xf32> -> vector<8x128xf32>
    %cst_17 = arith.constant dense<0.000000e+00> : vector<8xf32>
    %37 = vector.multi_reduction <add>, %36, %cst_17 [1] : vector<8x128xf32> to vector<8xf32>
    %38 = vector.shape_cast %37 : vector<8xf32> to vector<8x1xf32>
    %39 = vector.extract_strided_slice %38 {offsets = [0, 0], sizes = [1, 1], strides = [1, 1]} : vector<8x1xf32> to vector<1x1xf32>
    %40 = vector.extract_strided_slice %38 {offsets = [1, 0], sizes = [1, 1], strides = [1, 1]} : vector<8x1xf32> to vector<1x1xf32>
    %41 = vector.extract_strided_slice %38 {offsets = [2, 0], sizes = [1, 1], strides = [1, 1]} : vector<8x1xf32> to vector<1x1xf32>
    %42 = vector.extract_strided_slice %38 {offsets = [3, 0], sizes = [1, 1], strides = [1, 1]} : vector<8x1xf32> to vector<1x1xf32>
    %43 = vector.extract_strided_slice %38 {offsets = [4, 0], sizes = [1, 1], strides = [1, 1]} : vector<8x1xf32> to vector<1x1xf32>
    %44 = vector.extract_strided_slice %38 {offsets = [5, 0], sizes = [1, 1], strides = [1, 1]} : vector<8x1xf32> to vector<1x1xf32>
    %cst_18 = arith.constant 0.000000e+00 : f32
    %45 = vector.broadcast %cst_18 : f32 to vector<1x1xf32>
    %46 = arith.subf %45, %39 : vector<1x1xf32>
    %cst_19 = arith.constant 7.812500e-03 : f32
    %47 = vector.broadcast %cst_19 : f32 to vector<1x1xf32>
    %48 = arith.mulf %46, %47 : vector<1x1xf32>
    %cst_20 = arith.constant 7.812500e-03 : f32
    %49 = vector.broadcast %cst_20 : f32 to vector<1x1xf32>
    %50 = arith.mulf %40, %49 : vector<1x1xf32>
    %cst_21 = arith.constant 7.812500e-03 : f32
    %51 = vector.broadcast %cst_21 : f32 to vector<1x1xf32>
    %52 = arith.mulf %41, %51 : vector<1x1xf32>
    %cst_22 = arith.constant 1.280000e+02 : f32
    %53 = vector.broadcast %cst_22 : f32 to vector<1x1xf32>
    %54 = arith.mulf %53, %50 : vector<1x1xf32>
    %55 = arith.mulf %54, %52 : vector<1x1xf32>
    %56 = arith.subf %44, %55 : vector<1x1xf32>
    %cst_23 = arith.constant 1.280000e+02 : f32
    %57 = vector.broadcast %cst_23 : f32 to vector<1x1xf32>
    %58 = arith.mulf %57, %50 : vector<1x1xf32>
    %59 = arith.mulf %58, %50 : vector<1x1xf32>
    %60 = arith.subf %42, %59 : vector<1x1xf32>
    %cst_24 = arith.constant 1.280000e+02 : f32
    %61 = vector.broadcast %cst_24 : f32 to vector<1x1xf32>
    %62 = arith.mulf %61, %52 : vector<1x1xf32>
    %63 = arith.mulf %62, %52 : vector<1x1xf32>
    %64 = arith.subf %43, %63 : vector<1x1xf32>
    %65 = arith.mulf %60, %64 : vector<1x1xf32>
    %cst_25 = arith.constant 9.99999996E-13 : f32
    %66 = vector.broadcast %cst_25 : f32 to vector<1x1xf32>
    %67 = arith.addf %65, %66 : vector<1x1xf32>
    %68 = math.rsqrt %67 : vector<1x1xf32>
    %69 = arith.mulf %56, %68 : vector<1x1xf32>
    %c0_26 = arith.constant 0 : index
    %c0_27 = arith.constant 0 : index
    %70 = vector.load %arg2[%c0_26, %c0_27] : memref<1x2xf32, #tpu.memory_space<vmem>>, vector<1x1xf32>
    tpu.vector_store %arg2[%c0_26, %c0_27], %48 {strides = array<i32>} : memref<1x2xf32, #tpu.memory_space<vmem>>, vector<1x1xf32>,
    %c0_28 = arith.constant 0 : index
    %c1 = arith.constant 1 : index
    %71 = vector.load %arg2[%c0_28, %c1] : memref<1x2xf32, #tpu.memory_space<vmem>>, vector<1x1xf32>
    tpu.vector_store %arg2[%c0_28, %c1], %69 {strides = array<i32>} : memref<1x2xf32, #tpu.memory_space<vmem>>, vector<1x1xf32>,
    return
  }
}

</mosaic_0001>

<bundles_post_ra>
// kernel: corr_forward.1
= control target key start
LH: loop header
LB: loop body
LE: loop exit
PB: predicated region body
PF: predicated region fallthrough
CT: control target
= control target key end

     0   :  { %7 = vsyncpa [#allocation3], 0  ;;  %s535_s9 = smov [#allocation2]   ;;  %s602_s0 = inlined_call_operand.vmem [shape: f32[24,128], index: 0, kind: input, shape index: {}]   ;;  %s603_s1 = inlined_call_operand.hbm [shape: f32[104,128], index: 1, kind: input, shape index: {}]   ;;  %s604_s2 = inlined_call_operand.vmem [shape: f32[1,2], index: 2, kind: output, shape index: {}]  }
   0x1   :  { %s15_s10 = sshll.u32 %s535_s9, 4  ;;  %s511_s13 = scalar_lea.hbm %s603_s1, 1664  ;;  %s16_s10 = int_to_ptr.vmem [resolvable:$true] %s15_s10 }
   0x2   :  { %p512_p0 = scmp.ne.s32.totalorder %s603_s1, %s511_s13  ;;  %p515_p1 = scmp.lt.u32.totalorder %s511_s13, %s603_s1 }
   0x4   :  { %p517_p2 = pnand %p515_p1, %p512_p0 }
   0x6   :  { %520 = shalt.err (!%p517_p2)
}
   0x7   :  { %s521_s18 = scalar_lea.vmem %s16_s10, 1664  ;;  %p526_p4 = scmp.lt.s32.totalorder %s16_s10, %s16_s10 }
   0x8   :  { %p522_p3 = scmp.ne.s32.totalorder %s16_s10, %s521_s18  ;;  %p527_p5 = scmp.lt.s32.totalorder %s521_s18, %s521_s18 }
   0xa   :  { %p528_p6 = por %p527_p5, %p526_p4 }
   0xc   :  { %p529_p7 = pnand %p528_p6, %p522_p3 }
   0xe   :  { %532 = shalt.err (!%p529_p7)
}
   0xf   :  { %s536_s19 = smov 128   ;;  %s537_s20 = smov 8  }
  0x10   :  { %21 = dma.hbm_to_vmem [thread:$0]  %s603_s1, 1664, %s16_s10, [#allocation3], %s536_s19, %s536_s19, %s537_s20  }
  0x11   :  { %533 = dma.done.wait [#allocation3], 1664  }
  0x12   :  { %534 = vsyncadd [#allocation3], 4294965632  ;;  %vm34_vm0 = vcmask 138240   ;;  %v25_v0 = vld [vmem:[%s602_s0] sm:$0xff]  ;;  %v26_v1 = vld [vmem:[%s602_s0 + $0x8] sm:$0xff]  ;;  %vm47_vm1 = vcmask 1040384  }
  0x13   :  { %v478_v2 = vpack.c.bf16 %v26_v1, %v25_v0  ;;  %v30_v3 = vld [vmem:[#allocation2] sm:$0xff]  ;;  %v27_v4 = vld [vmem:[%s602_s0 + $0x10] sm:$0x1]  ;;  %v31_v5 = vld [vmem:[#allocation2 + $0x8] sm:$0xff]  ;;  %vm148_vm2 = vcmask 261120   ;;  %v538_v22 = vmov 0.0|0.0  }
  0x14   :  { %447 = vmatprep.mubr.msk.f32.mxu0 %vm34_vm0, %v30_v3  ;;  %v32_v6 = vld [vmem:[#allocation2 + $0x10] sm:$0xff]  ;;  %v33_v7 = vld [vmem:[#allocation2 + $0x18] sm:$0xff]  ;;  %v140_v8 = vld [vmem:[#allocation2 + $0x20] sm:$0xff]  ;;  %vm539_vm3 = vmmov 0   ;;  %v540_v23 = vmov 0.0   ;;  %vm359_vm4 = vcmask 1041408  }
  0x15   :  { %479 = vmatprep.subr.bf16.mxu0 %v478_v2  ;;  %461 = vmatprep.mubr.msk.f32.mxu1 %vm148_vm2, %v140_v8  ;;  %v141_v19 = vld [vmem:[#allocation2 + $0x28] sm:$0xff]  ;;  %v142_v20 = vld [vmem:[#allocation2 + $0x30] sm:$0xff]  ;;  %v143_v21 = vld [vmem:[#allocation2 + $0x38] sm:$0xff]  ;;  %vm361_vm5 = vcmask 1042432   ;;  %vm363_vm6 = vcmask 1043456   ;;  %vm365_vm7 = vcmask 1044480  }
  0x16   :  { %481 = vmatpush3.bf16.msra.mxu0 %v478_v2  ;;  %v145_v24 = vld [vmem:[#allocation2 + $0x48] sm:$0xff]  ;;  %v144_v25 = vld [vmem:[#allocation2 + $0x40] sm:$0xff]  ;;  %v147_v30 = vld [vmem:[#allocation2 + $0x58] sm:$0xff]  ;;  %vm367_vm8 = vcmask 1045504   ;;  %vm398_vm9 = vcmask 0   ;;  %s541_s5 = smov 1  }
  0x17   :  { %445 = vmatprep.subr.msk.mxu0 %vm47_vm1, %v27_v4  ;;  %v146_v32 = vld [vmem:[#allocation2 + $0x50] sm:$0xff]  ;;  %v250_v42 = vld [vmem:[#allocation2 + $0x60] sm:$0x1]  ;;  %v251_v43 = vld [vmem:[#allocation2 + $0x61] sm:$0x1]  ;;  %vm404_vm10 = vcmask 13325  }
  0x18   :  { %v29_v58 = vld [vmem:[%s602_s0 + $0x12] sm:$0x1]  ;;  %v28_v59 = vld [vmem:[%s602_s0 + $0x11] sm:$0x1] }
  0x19   :  { %v341_v61 = vmul.f32 %v29_v58, %v29_v58  ;;  %v347_v0 = vrot.slane %v29_v58, 6 }
  0x1a   :  { %446 = vmatpush3.msk.msra.mxu0 %vm47_vm1, %v27_v4 }
  0x1b   :  { %448 = vmatmul.mubr.msk.f32.vlgmr.msra.gmra.mrb[0].mxu0 %vm34_vm0, %v31_v5  ;;  %490 = vmatprep.subr.bf16.mxu0 %v538_v22  ;;  %v353_v5 = vrot.slane %v341_v61, 4 }
  0x1c   :  { %450 = vmatprep.mubr.msk.f32.mxu0 %vm34_vm0, %v32_v6 }
  0x1f   :  { %451 = vmatmul.mubr.msk.f32.gmra.mrb[2].mxu0 %vm34_vm0, %v33_v7 }
  0x20   :  { %475 = vmatprep.mubr.msk.f32.mxu0 %vm539_vm3, %v540_v23 }
  0xee   :  { %v449_v9 = vpop.f32.mrb[0].mxu0 }
  0xef   :  { %v137_v10 = vmax.f32 %v449_v9, 0.0  ;;  %v117_v11 = vpop.f32.mrb[1].mxu0 }
  0xf0   :  { %v136_v12 = vmax.f32 %v117_v11, 0.0 }
  0xf2   :  { %v452_v13 = vpop.f32.mrb[2].mxu0  ;;  %v482_v14 = vpack.c.bf16 %v137_v10, %v136_v12 }
  0xf3   :  { %v139_v15 = vmax.f32 %v452_v13, 0.0  ;;  %v127_v16 = vpop.f32.mrb[3].mxu0 }
  0xf4   :  { %v138_v17 = vmax.f32 %v127_v16, 0.0  ;;  %483 = vmatprep.subr.bf16.mxu1 %v482_v14 }
  0xf5   :  { %485 = vmatpush3.bf16.msra.mxu1 %v482_v14 }
  0xf6   :  { %v486_v18 = vpack.c.bf16 %v139_v15, %v138_v17 }
  0xf8   :  { %487 = vmatprep.subr.bf16.mxu1 %v486_v18 }
  0xf9   :  { %489 = vmatpush3.bf16.msra.mxu1 %v486_v18 }
  0xfc   :  { %462 = vmatmul.mubr.msk.f32.vlgmr.msra.gmra.mrb[0].mxu1 %vm148_vm2, %v141_v19 }
  0xfd   :  { %464 = vmatprep.mubr.msk.f32.mxu1 %vm148_vm2, %v142_v20 }
 0x100   :  { %465 = vmatmul.mubr.msk.f32.gmra.mrb[2].mxu1 %vm148_vm2, %v143_v21 }
 0x1cf   :  { %v463_v26 = vpop.f32.mrb[0].mxu1 }
 0x1d0   :  { %v233_v27 = vadd.f32 %v463_v26, %v145_v24  ;;  %v227_v28 = vpop.f32.mrb[1].mxu1 }
 0x1d1   :  { %v228_v29 = vadd.f32 %v227_v28, %v144_v25 }
 0x1d2   :  { %v247_v31 = vmax.f32 %v233_v27, 0.0 }
 0x1d3   :  { %v246_v33 = vmax.f32 %v228_v29, 0.0  ;;  %v466_v34 = vpop.f32.mrb[2].mxu1 }
 0x1d4   :  { %v243_v35 = vadd.f32 %v466_v34, %v147_v30  ;;  %v237_v36 = vpop.f32.mrb[3].mxu1 }
 0x1d5   :  { %v491_v37 = vpack.c.bf16 %v247_v31, %v246_v33  ;;  %v238_v38 = vadd.f32 %v237_v36, %v146_v32 }
 0x1d6   :  { %v249_v39 = vmax.f32 %v243_v35, 0.0 }
 0x1d7   :  { %v248_v40 = vmax.f32 %v238_v38, 0.0  ;;  %492 = vmatpush3.bf16.msra.mxu0 %v491_v37 }
 0x1d8   :  { %493 = vmatprep.subr.bf16.mxu0 %v538_v22 }
 0x1d9   :  { %v494_v41 = vpack.c.bf16 %v249_v39, %v248_v40 }
 0x1db   :  { %495 = vmatpush3.bf16.msra.mxu0 %v494_v41 }
 0x1de   :  { %476 = vmatmul.mubr.msk.f32.vlgmr.msra.gmra.mrb[4].mxu0 %vm148_vm2, %v250_v42 }
 0x2b1   :  { %v321_v44 = vpop.f32.mrb[4].mxu0 }
 0x2b2   :  { %v322_v45 = vadd.f32 %v321_v44, %v251_v43  ;;  %v477_v46 = vpop.f32.mrb[5].mxu0 }
 0x2b4   :  { %v326_v47 = vand.u32 2147483647, %v322_v45  ;;  %v325_v53 = vmax.f32 %v322_v45, 0.0  ;;  %v334_v62 = vmul.f32 %v322_v45, %v28_v59 }
 0x2b6   :  { %v327_v48 = vsub.f32 0.0, %v326_v47 }
 0x2b8   :  { %v328_v49 = vmul.f32 1.442695, %v327_v48 }
 0x2ba   :  { %503 = vpow2.f32 %v328_v49 }
 0x2c4   :  { %v504_v50 = vpop.eup %503 }
 0x2c5   :  { %v330_v51 = vadd.f32 1.0, %v504_v50 }
 0x2c7   :  { %505 = vlog2.f32 %v330_v51 }
 0x2d1   :  { %v506_v52 = vpop.eup %505 }
 0x2d2   :  { %v332_v54 = vmul.f32 0.6931472, %v506_v52 }
 0x2d4   :  { %v333_v55 = vadd.f32 %v332_v54, %v325_v53 }
 0x2d6   :  { %v336_v56 = vsub.f32 %v322_v45, %v333_v55  ;;  %v335_v1 = vsub.f32 %v334_v62, %v333_v55 }
 0x2d8   :  { %v337_v57 = vmul.f32 1.442695, %v336_v56 }
 0x2da   :  { %507 = vpow2.f32 %v337_v57 }
 0x2e4   :  { %v508_v60 = vpop.eup %507 }
 0x2e5   :  { %v339_v63 = vmul.f32 %v508_v60, %v28_v59 }
 0x2e7   :  { %v340_v2 = vmul.f32 %v339_v63, %v339_v63  ;;  %v342_v3 = vmul.f32 %v339_v63, %v29_v58  ;;  %v344_v4 = vrot.slane %v339_v63, 7 }
 0x2e9   :  { %v350_v6 = vrot.slane %v340_v2, 5  ;;  %v358_v7 = vsel %vm47_vm1, %v335_v1, %v344_v4  ;;  %v356_v9 = vrot.slane %v342_v3, 3 }
 0x2ea   :  { %v360_v8 = vsel %vm359_vm4, %v358_v7, %v347_v0 }
 0x2eb   :  { %v362_v10 = vsel %vm361_vm5, %v360_v8, %v350_v6 }
 0x2ec   :  { %v364_v11 = vsel %vm363_vm6, %v362_v10, %v353_v5 }
 0x2ed   :  { %v366_v12 = vsel %vm365_vm7, %v364_v11, %v356_v9 }
 0x2ee   :  { %v368_v13 = vsel %vm367_vm8, %v366_v12, 0.0 }
 0x2ef   :  { %369 = vadd.xlane.f32.xlu0 %v368_v13 }
 0x37c   :  { %v370_v14 = vpop.xlane.xlu0 %369 }
 0x37d   :  { %v371_v15 = vsub.f32 0.0, %v370_v14  ;;  %v373_v16 = vmul.f32 0.0078125, %v370_v14 }
 0x37f   :  { %v372_v17 = vmul.f32 0.0078125, %v371_v15  ;;  %v374_v18 = vmul.f32 128.0, %v373_v16  ;;  %v376_v25 = vrot.slane %v373_v16, 1 }
 0x381   :  { %v383_v19 = vmul.f32 %v374_v18, %v373_v16  ;;  %399 = vst.msk [vmem:[%s604_s2] sm:$0x1] %vm398_vm9, %v372_v17  ;;  %v378_v26 = vmul.f32 %v376_v25, %v374_v18 }
 0x383   :  { %v385_v20 = vrot.slane %v383_v19, 6  ;;  %v380_v27 = vrot.slane %v378_v26, 4 }
 0x385   :  { %v387_v21 = vsub.f32 %v370_v14, %v385_v20  ;;  %v382_v29 = vsub.f32 %v370_v14, %v380_v27 }
 0x387   :  { %v389_v22 = vrot.slane %v387_v21, 1 }
 0x389   :  { %v391_v23 = vmul.f32 %v389_v22, %v387_v21 }
 0x38b   :  { %v392_v24 = vadd.f32 1e-12, %v391_v23 }
 0x38d   :  { %509 = vrsqrt.f32 %v392_v24 }
 0x397   :  { %v510_v28 = vpop.eup %509 }
 0x398   :  { %v395_v30 = vrot.slane %v510_v28, 6 }
 0x39a   :  { %v397_v31 = vmul.f32 %v395_v30, %v382_v29 }
 0x39c   :  { %401 = vrot.lane.b32.xlu0 %v397_v31, %s541_s5 }
 0x40e   :  { %v402_v32 = vpop.permute.xlu0 %401 }
 0x40f   :  { %405 = vst.msk [vmem:[%s604_s2 - $0x5] sm:$0x20] %vm404_vm10, %v402_v32 }
 0x410   :  { %410 = vsyncpa [#allocation3], 1 }

</bundles_post_ra>
